<compile_context>
chip_gen: v7x
topology: tpu7x:2x2x1
jax: 0.10.0
libtpu: 0.0.40
codegen_flags: <defaults>
</compile_context>

<pallas_src>
import jax
import jax.numpy as jnp
from jax.experimental import pallas as pl
from jax.experimental.pallas import tpu as pltpu


# ----------------------------- Pallas kernels -----------------------------

def _matmul_bias_relu_kernel(x_ref, w_ref, b_ref, o_ref):
    # x_ref: (TM, K) bf16, w_ref: (K, Cout) bf16, b_ref: (1, Cout) f32
    y = jnp.dot(x_ref[...], w_ref[...], preferred_element_type=jnp.float32)
    y = y + b_ref[...]
    o_ref[...] = jnp.maximum(y, 0.0).astype(o_ref.dtype)


def _make_dwpw_kernel(stride, th, wo, n_x):
    """Fused depthwise-3x3(+BN+ReLU) -> pointwise-1x1(+BN+ReLU).

    stride == 1: one input ref holding the padded image (1, H+2, W+2, Cin).
    stride == 2: four space-to-depth refs (even/odd rows x even/odd cols of
                 the padded image), each (1, H/2+1, W/2+1, Cin), so every tap
                 is a contiguous window at true stride 2.
    """

    def kernel(*refs):
        x_refs = refs[:n_x]
        w_dw_ref, b_dw_ref, w_pw_ref, b_pw_ref, o_ref = refs[n_x:]
        cin = w_dw_ref.shape[1]
        r0 = pl.program_id(1) * th

        # 9-tap depthwise accumulation over a (th, wo, cin) row block (f32).
        acc = None
        for kh in range(3):
            for kw in range(3):
                if stride == 1:
                    win = x_refs[0][0, pl.ds(r0 + kh, th), pl.ds(kw, wo), :]
                else:
                    arr = x_refs[(kh % 2) * 2 + (kw % 2)]
                    win = arr[0, pl.ds(r0 + kh // 2, th), pl.ds(kw // 2, wo), :]
                tap = win.astype(jnp.float32) * w_dw_ref[kh * 3 + kw, :]
                acc = tap if acc is None else acc + tap

        y = jnp.maximum(acc + b_dw_ref[0, :], 0.0)             # dw BN + ReLU
        y = y.astype(jnp.bfloat16).reshape(th * wo, cin)       # rows for MXU
        z = jnp.dot(y, w_pw_ref[...], preferred_element_type=jnp.float32)
        z = jnp.maximum(z + b_pw_ref[...], 0.0)                # pw BN + ReLU
        o_ref[...] = z.reshape(1, th, wo, -1).astype(o_ref.dtype)

    return kernel


def _avgpool_fc_kernel(x_ref, w_ref, b_ref, o_ref):
    # x_ref: (N, 49, 1024) bf16, w_ref: (1024, 1000) bf16, b_ref: (1, 1000) f32
    pooled = jnp.mean(x_ref[...].astype(jnp.float32), axis=1)  # AvgPool2d(7)
    y = jnp.dot(pooled.astype(jnp.bfloat16), w_ref[...],
                preferred_element_type=jnp.float32)
    o_ref[...] = (y + b_ref[...]).astype(o_ref.dtype)


# ----------------------------- kernel wrappers -----------------------------

def matmul_bias_relu(x2d, w, b, tile_m=512):
    """relu(x2d @ w + b), row-tiled bf16 matmul (BN scale already in w)."""
    M, K = x2d.shape
    cout = w.shape[1]
    mp = pl.cdiv(M, tile_m) * tile_m
    if mp != M:
        x2d = jnp.pad(x2d, ((0, mp - M), (0, 0)))
    out = pl.pallas_call(
        _matmul_bias_relu_kernel,
        out_shape=jax.ShapeDtypeStruct((mp, cout), jnp.bfloat16),
        grid=(mp // tile_m,),
        in_specs=[
            pl.BlockSpec((tile_m, K), lambda i: (i, 0)),
            pl.BlockSpec((K, cout), lambda i: (0, 0)),
            pl.BlockSpec((1, cout), lambda i: (0, 0)),
        ],
        out_specs=pl.BlockSpec((tile_m, cout), lambda i: (i, 0)),
        compiler_params=pltpu.CompilerParams(dimension_semantics=("parallel",)),
    )(x2d, w, b[None, :])
    return out[:M]


def conv3x3_bn_relu(x, w, b, stride):
    """Dense 3x3 conv, padding=1, BN folded into w, ReLU. im2col + MXU matmul."""
    N, H, W, cin = x.shape
    cout = w.shape[1]
    ho = (H + 2 - 3) // stride + 1
    wo = (W + 2 - 3) // stride + 1
    xp = jnp.pad(x, ((0, 0), (1, 1), (1, 1), (0, 0)))
    patches = []
    for kh in range(3):
        for kw in range(3):
            patches.append(
                jax.lax.slice(
                    xp,
                    (0, kh, kw, 0),
                    (N, kh + (ho - 1) * stride + 1, kw + (wo - 1) * stride + 1, cin),
                    (1, stride, stride, 1)))
    patches = jnp.concatenate(patches, axis=-1).reshape(N * ho * wo, 9 * cin)
    y = matmul_bias_relu(patches, w, b)
    return y.reshape(N, ho, wo, cout)


def _row_block(ho):
    # Output-row tile per fused block: >=2 grid steps when possible (pipelining
    # + both TensorCores on v7x) while keeping the accumulator small.
    if ho % 28 == 0 and ho > 28:
        return 28
    if ho % 14 == 0 and ho > 14:
        return 14
    if ho % 7 == 0 and ho > 7:
        return 7
    return ho


def fused_dw_pw(x, w_dw, b_dw, w_pw, b_pw, stride):
    """Fused depthwise-separable block: dw3x3(stride)+BN+ReLU -> pw1x1+BN+ReLU."""
    N, H, W, cin = x.shape
    cout = w_pw.shape[1]
    ho, wo = H // stride, W // stride
    th = _row_block(ho)
    nblk = ho // th

    xp = jnp.pad(x, ((0, 0), (1, 1), (1, 1), (0, 0)))          # spatial pad=1
    if stride == 1:
        xs = (xp,)
    else:
        # space-to-depth split so the kernel does true stride-2 with
        # contiguous window reads only.
        xs = (xp[:, 0::2, 0::2, :], xp[:, 0::2, 1::2, :],
              xp[:, 1::2, 0::2, :], xp[:, 1::2, 1::2, :])

    in_specs = [pl.BlockSpec((1,) + a.shape[1:], lambda n, r: (n, 0, 0, 0))
                for a in xs]
    in_specs += [
        pl.BlockSpec((9, cin), lambda n, r: (0, 0)),
        pl.BlockSpec((1, cin), lambda n, r: (0, 0)),
        pl.BlockSpec((cin, cout), lambda n, r: (0, 0)),
        pl.BlockSpec((1, cout), lambda n, r: (0, 0)),
    ]

    return pl.pallas_call(
        _make_dwpw_kernel(stride, th, wo, len(xs)),
        out_shape=jax.ShapeDtypeStruct((N, ho, wo, cout), jnp.bfloat16),
        grid=(N, nblk),
        in_specs=in_specs,
        out_specs=pl.BlockSpec((1, th, wo, cout), lambda n, r: (n, r, 0, 0)),
        compiler_params=pltpu.CompilerParams(
            dimension_semantics=("parallel", "parallel")),
    )(*xs, w_dw, b_dw[None, :], w_pw, b_pw[None, :])


def avgpool_fc(x, w, b):
    """AvgPool2d(7) + view(-1, 1024) + Linear(1024, 1000) in one kernel."""
    N, H, W, C = x.shape
    assert H == 7 and W == 7 and C == 1024
    xr = x.reshape(N, H * W, C)
    return pl.pallas_call(
        _avgpool_fc_kernel,
        out_shape=jax.ShapeDtypeStruct((N, w.shape[1]), jnp.float32),
    )(xr, w, b[None, :])


# ----------------------------- model definition -----------------------------

MOBILENET_CFG = [
    # (kind, in_ch, out_ch, stride)
    ("conv", 3, 32, 2),
    ("dw", 32, 64, 1),
    ("dw", 64, 128, 2),
    ("dw", 128, 128, 1),
    ("dw", 128, 256, 2),
    ("dw", 256, 256, 1),
    ("dw", 256, 512, 2),
    ("dw", 512, 512, 1),
    ("dw", 512, 512, 1),
    ("dw", 512, 512, 1),
    ("dw", 512, 512, 1),
    ("dw", 512, 512, 1),
    ("dw", 512, 1024, 2),
    ("dw", 1024, 1024, 1),
]


def _fold_bn(key, c):
    k1, k2, k3, k4 = jax.random.split(key, 4)
    gamma = 1.0 + 0.1 * jax.random.normal(k1, (c,), jnp.float32)
    beta = 0.05 * jax.random.normal(k2, (c,), jnp.float32)
    mean = 0.05 * jax.random.normal(k3, (c,), jnp.float32)
    var = 1.0 + 0.1 * jax.random.uniform(k4, (c,), jnp.float32)
    scale = gamma * jax.lax.rsqrt(var + 1e-5)
    bias = beta - mean * scale
    return scale, bias


def init_params(key):
    params = []
    for kind, cin, cout, stride in MOBILENET_CFG:
        if kind == "conv":
            key, kw_, kbn = jax.random.split(key, 3)
            w = jax.random.normal(kw_, (3, 3, cin, cout), jnp.float32) * jnp.sqrt(2.0 / (9 * cin))
            scale, bias = _fold_bn(kbn, cout)
            w = (w * scale).reshape(9 * cin, cout)               # fold BN scale
            params.append({"kind": "conv", "stride": stride,
                           "w": w.astype(jnp.bfloat16), "b": bias})
        else:
            key, kdw, kbn1, kpw, kbn2 = jax.random.split(key, 5)
            w_dw = jax.random.normal(kdw, (9, cin), jnp.float32) * jnp.sqrt(2.0 / 9.0)
            s1, b1 = _fold_bn(kbn1, cin)
            w_pw = jax.random.normal(kpw, (cin, cout), jnp.float32) * jnp.sqrt(2.0 / cin)
            s2, b2 = _fold_bn(kbn2, cout)
            params.append({"kind": "dw", "stride": stride,
                           "w_dw": w_dw * s1,                        # f32, BN-scale folded
                           "b_dw": b1,
                           "w_pw": (w_pw * s2).astype(jnp.bfloat16),  # bf16, BN-scale folded
                           "b_pw": b2})
    key, kfw, kfb = jax.random.split(key, 3)
    fc_w = jax.random.normal(kfw, (1024, 1000), jnp.float32) * jnp.sqrt(1.0 / 1024.0)
    fc_b = 0.01 * jax.random.normal(kfb, (1000,), jnp.float32)
    params.append({"kind": "fc", "w": fc_w.astype(jnp.bfloat16), "b": fc_b})
    return params


def mobilenet_v1_forward(x_nchw, params):
    x = jnp.transpose(x_nchw, (0, 2, 3, 1)).astype(jnp.bfloat16)   # NCHW -> NHWC
    for p in params:
        if p["kind"] == "conv":
            x = conv3x3_bn_relu(x, p["w"], p["b"], p["stride"])
        elif p["kind"] == "dw":
            x = fused_dw_pw(x, p["w_dw"], p["b_dw"], p["w_pw"], p["b_pw"], p["stride"])
        else:  # fc head (avgpool + view + linear)
            x = avgpool_fc(x, p["w"], p["b"])
    return x


# ----------------------------- main -----------------------------

if __name__ == "__main__":
    key = jax.random.PRNGKey(0)
    # The forward structure (5 stride-2 stages, AvgPool2d(7), view(-1, 1024))
    # implies a 3x224x224 input; batch 1 keeps this small.
    x = jax.random.normal(key, (1, 3, 224, 224), jnp.float32)
    params = init_params(jax.random.PRNGKey(42))

    out = mobilenet_v1_forward(x, params)
    out = jax.block_until_ready(out)

    assert out.shape == (1, 1000), out.shape
    assert bool(jnp.all(jnp.isfinite(out)))
    print("KERNEL_OK")
</pallas_src>

<mosaic_0001>
module attributes {stable_mosaic.version = 11 : i64} {
  func.func @_matmul_bias_relu_kernel(%arg0: i32, %arg1: memref<512x27xbf16, #tpu.memory_space<vmem>>, %arg2: memref<27x32xbf16, #tpu.memory_space<vmem>>, %arg3: memref<1x32xf32, #tpu.memory_space<vmem>>, %arg4: memref<512x32xbf16, #tpu.memory_space<vmem>>) attributes {dimension_semantics = [#tpu.dimension_semantics<parallel>], iteration_bounds = array<i64: 25>, scalar_prefetch = 0 : i64, scratch_operands = 0 : i64, tpu.core_type = #tpu.core_type<tc>, window_params = [{transform_indices = @transform_0, window_bounds = array<i64: 512, 27>}, {pipeline_mode = #tpu.pipeline_mode<synchronous>, transform_indices = @transform_1, window_bounds = array<i64: 27, 32>}, {pipeline_mode = #tpu.pipeline_mode<synchronous>, transform_indices = @transform_2, window_bounds = array<i64: 1, 32>}, {transform_indices = @transform_3, window_bounds = array<i64: 512, 32>}]} {
    %c0 = arith.constant 0 : index
    %c0_0 = arith.constant 0 : index
    %0 = vector.load %arg1[%c0, %c0_0] : memref<512x27xbf16, #tpu.memory_space<vmem>>, vector<512x27xbf16>
    %c0_1 = arith.constant 0 : index
    %c0_2 = arith.constant 0 : index
    %1 = vector.load %arg2[%c0_1, %c0_2] : memref<27x32xbf16, #tpu.memory_space<vmem>>, vector<27x32xbf16>
    %cst = arith.constant dense<0.000000e+00> : vector<512x32xf32>
    %2 = tpu.matmul %0, %1, %cst {dimension_numbers = #tpu.dot_dimension_numbers<[1], [0], [0], [1], [0, 0, 1, 1], [], []>} : vector<512x27xbf16>, vector<27x32xbf16>, vector<512x32xf32> -> vector<512x32xf32>
    %c0_3 = arith.constant 0 : index
    %c0_4 = arith.constant 0 : index
    %3 = vector.load %arg3[%c0_3, %c0_4] : memref<1x32xf32, #tpu.memory_space<vmem>>, vector<1x32xf32>
    %4 = vector.broadcast %3 : vector<1x32xf32> to vector<512x32xf32>
    %5 = arith.addf %2, %4 : vector<512x32xf32>
    %cst_5 = arith.constant 0.000000e+00 : f32
    %6 = vector.broadcast %cst_5 : f32 to vector<512x32xf32>
    %7 = arith.maximumf %5, %6 : vector<512x32xf32>
    %8 = arith.truncf %7 : vector<512x32xf32> to vector<512x32xbf16>
    %c0_6 = arith.constant 0 : index
    %c0_7 = arith.constant 0 : index
    %9 = vector.load %arg4[%c0_6, %c0_7] : memref<512x32xbf16, #tpu.memory_space<vmem>>, vector<512x32xbf16>
    tpu.vector_store %arg4[%c0_6, %c0_7], %8 {strides = array<i32>} : memref<512x32xbf16, #tpu.memory_space<vmem>>, vector<512x32xbf16>,
    return
  }
  func.func @transform_0(%arg0: i32) -> (i32, i32) {
    %c0_i32 = arith.constant 0 : i32
    %c0_i32_0 = arith.constant 0 : i32
    return %arg0, %c0_i32 : i32, i32
  }
  func.func @transform_1(%arg0: i32) -> (i32, i32) {
    %c0_i32 = arith.constant 0 : i32
    %c0_i32_0 = arith.constant 0 : i32
    %c0_i32_1 = arith.constant 0 : i32
    return %c0_i32, %c0_i32_0 : i32, i32
  }
  func.func @transform_2(%arg0: i32) -> (i32, i32) {
    %c0_i32 = arith.constant 0 : i32
    %c0_i32_0 = arith.constant 0 : i32
    %c0_i32_1 = arith.constant 0 : i32
    return %c0_i32, %c0_i32_0 : i32, i32
  }
  func.func @transform_3(%arg0: i32) -> (i32, i32) {
    %c0_i32 = arith.constant 0 : i32
    %c0_i32_0 = arith.constant 0 : i32
    return %arg0, %c0_i32 : i32, i32
  }
}

</mosaic_0001>

<bundles_post_ra>
// kernel: tpu_custom_call.1
= control target key start
LH: loop header
LB: loop body
LE: loop exit
PB: predicated region body
PF: predicated region fallthrough
CT: control target
= control target key end

     0   :  { %s1639_s12 = smov 0   ;;  %s1934_s0 = inlined_call_operand.vmem [shape: bf16[12800,27], index: 0, kind: input, shape index: {}]   ;;  %s1935_s1 = inlined_call_operand.vmem [shape: bf16[27,32], index: 1, kind: input, shape index: {}]   ;;  %s1936_s2 = inlined_call_operand.vmem [shape: f32[1,32], index: 2, kind: input, shape index: {}]   ;;  %s1937_s3 = inlined_call_operand.vmem [shape: bf16[12800,32], index: 3, kind: output, shape index: {}]  }
   0x1 LB: > { %s1255_s13 = sadd.s32 4294967295, %s1616_s12   ;;  %p1259_p0 = scmp.ge.s32.totalorder %s1616_s12, 1  ;;  %s1616_s12 = sphi %s1639_s12, %s13_s12  }
   0x2   : > { %p138_p1 = scmp.lt.s32.totalorder %s1616_s12, 26 }
   0x4   : > { %p139_p2 = pnand %p1259_p0, %p138_p1 }
   0x5   : > { %v1576_v0 = vld [vmem:[%s1935_s1] sm:$0xff] (!%p139_p2)   ;;  %vm518_vm0 = vcmask (!%p139_p2), 1044480   ;;  %v1577_v1 = vld [vmem:[%s1935_s1 + $0x8] sm:$0x3f] (!%p139_p2)   ;;  %vm519_vm1 = vcmask (!%p139_p2), 1045504   ;;  %s1260_s18 = sshll.u32 (!%p139_p2), %s1255_s13, 6 }
   0x6   : > { %142 = sbr.rel (%p139_p2) target bundleno = 297 (0x129), region = 32  ;;  %1495 = vmatprep.subr.bf16.mxu0 (!%p139_p2), %v1576_v0  ;;  %1563 = vmatprep.subr.bf16.mxu1 (!%p139_p2), %v1576_v0  ;;  %v1618_v2 = vmov (!%p139_p2), 65535   ;;  %p163_p3 = scmp.lt.s32.totalorder (!%p139_p2), %s1260_s18, 1599  ;;  %vm421_vm2 = vcmask (!%p139_p2), 220160   ;;  %v1730_v38 = vld [vmem:[%s1936_s2] ss:$0 sm:$0xff] (!%p139_p2) }
   0x7   : > { %1496 = vmatpush3.bf16.msra.mxu0 (!%p139_p2), %v1576_v0  ;;  %1565 = vmatpush3.bf16.msra.mxu1 (!%p139_p2), %v1576_v0  ;;  %v520_v3 = vsel (!%p139_p2), %vm518_vm0, 4294967295, %v1618_v2  ;;  %vm1134_vm3 = vcmask (!%p139_p2), 257024  }
   0x8   : > { %v521_v4 = vsel (!%p139_p2), %vm519_vm1, %v520_v3, 0 }
   0x9   : > { %v523_v5 = vand.u32 (!%p139_p2), %v1577_v1, %v521_v4 }
   0xb   : > { %1497 = vmatprep.subr.bf16.mxu0 (!%p139_p2), %v523_v5  ;;  %1564 = vmatprep.subr.bf16.mxu1 (!%p139_p2), %v523_v5 }
   0xc   : > { %1498 = vmatpush3.bf16.msra.mxu0 (!%p139_p2), %v523_v5  ;;  %1566 = vmatpush3.bf16.msra.mxu1 (!%p139_p2), %v523_v5 }
   0xd   : > { %s1939_s18 = smov (!%p163_p3, %s1260_s18), 1599 }
   0xe   : > { %s1261_s19 = sshll.u32 %s1939_s18, 2 }
   0xf   : > { %s1661_s22 = scalar_lea.vmem %s1934_s0, %s1261_s19  ;;  %s1742_s27 = scalar_lea.vmem %s1937_s3, %s1261_s19 }
  0x10   : > { %v1578_v6 = vld [vmem:[%s1661_s22] sm:$0xff]   ;;  %v1580_v8 = vld [vmem:[%s1661_s22 + $0x8] sm:$0xff]   ;;  %v1582_v10 = vld [vmem:[%s1661_s22 + $0x10] sm:$0xff]  }
  0x11   : > { %v1579_v7 = vld [vmem:[%s1661_s22 + $0x80] sm:$0xff]   ;;  %1499 = vmatprep.mubr.msk.bf16.mxu0 %vm421_vm2, %v1578_v6  ;;  %v1581_v9 = vld [vmem:[%s1661_s22 + $0x88] sm:$0xff]   ;;  %v1583_v11 = vld [vmem:[%s1661_s22 + $0x90] sm:$0xff]  }
  0x12   : > { %1531 = vmatprep.mubr.msk.bf16.mxu1 %vm421_vm2, %v1579_v7  ;;  %1500 = vmatmul.mubr.msk.bf16.vlgmr.msra.gmra.mrb[0].mxu0 %vm421_vm2, %v1580_v8  ;;  %v1584_v12 = vld [vmem:[%s1661_s22 + $0x18] sm:$0xff]   ;;  %v1586_v14 = vld [vmem:[%s1661_s22 + $0x20] sm:$0xff]   ;;  %v1588_v16 = vld [vmem:[%s1661_s22 + $0x28] sm:$0xff]  }
  0x13   : > { %1532 = vmatmul.mubr.msk.bf16.vlgmr.msra.gmra.mrb[0].mxu1 %vm421_vm2, %v1581_v9  ;;  %1503 = vmatprep.mubr.msk.bf16.mxu0 %vm421_vm2, %v1582_v10  ;;  %v1585_v13 = vld [vmem:[%s1661_s22 + $0x98] sm:$0xff]   ;;  %v1587_v15 = vld [vmem:[%s1661_s22 + $0xa0] sm:$0xff]   ;;  %v1589_v17 = vld [vmem:[%s1661_s22 + $0xa8] sm:$0xff]  }
  0x14   : > { %1535 = vmatprep.mubr.msk.bf16.mxu1 %vm421_vm2, %v1583_v11  ;;  %v1590_v18 = vld [vmem:[%s1661_s22 + $0x30] sm:$0xff]   ;;  %v1592_v20 = vld [vmem:[%s1661_s22 + $0x38] sm:$0xff]   ;;  %v1594_v22 = vld [vmem:[%s1661_s22 + $0x40] sm:$0xff]  }
  0x15   : > { %v1591_v19 = vld [vmem:[%s1661_s22 + $0xb0] sm:$0xff]   ;;  %v1593_v21 = vld [vmem:[%s1661_s22 + $0xb8] sm:$0xff]   ;;  %v1595_v23 = vld [vmem:[%s1661_s22 + $0xc0] sm:$0xff]  }
  0x16   : > { %v1596_v24 = vld [vmem:[%s1661_s22 + $0x48] sm:$0xff]   ;;  %v1598_v26 = vld [vmem:[%s1661_s22 + $0x50] sm:$0xff]   ;;  %v1600_v28 = vld [vmem:[%s1661_s22 + $0x58] sm:$0xff]  }
  0x17   : > { %v1597_v25 = vld [vmem:[%s1661_s22 + $0xc8] sm:$0xff]   ;;  %v1599_v27 = vld [vmem:[%s1661_s22 + $0xd0] sm:$0xff]   ;;  %v1601_v29 = vld [vmem:[%s1661_s22 + $0xd8] sm:$0xff]  }
  0x18   : > { %v1602_v30 = vld [vmem:[%s1661_s22 + $0x60] sm:$0xff]   ;;  %v1604_v32 = vld [vmem:[%s1661_s22 + $0x68] sm:$0xff]   ;;  %v1606_v34 = vld [vmem:[%s1661_s22 + $0x70] sm:$0xff]  }
  0x19   : > { %v1603_v31 = vld [vmem:[%s1661_s22 + $0xe0] sm:$0xff]   ;;  %v1605_v33 = vld [vmem:[%s1661_s22 + $0xe8] sm:$0xff]   ;;  %v1607_v35 = vld [vmem:[%s1661_s22 + $0xf0] sm:$0xff]  }
  0x1a   : > { %1504 = vmatmul.mubr.msk.bf16.gmra.mrb[4].mxu0 %vm421_vm2, %v1584_v12  ;;  %v1608_v36 = vld [vmem:[%s1661_s22 + $0x78] sm:$0xff]  }
  0x1b   : > { %1536 = vmatmul.mubr.msk.bf16.gmra.mrb[4].mxu1 %vm421_vm2, %v1585_v13  ;;  %1507 = vmatprep.mubr.msk.bf16.mxu0 %vm421_vm2, %v1586_v14  ;;  %v1609_v37 = vld [vmem:[%s1661_s22 + $0xf8] sm:$0xff]  }
  0x1c   : > { %1539 = vmatprep.mubr.msk.bf16.mxu1 %vm421_vm2, %v1587_v15 }
  0x22   : > { %1508 = vmatmul.mubr.msk.bf16.gmra.mrb[8].mxu0 %vm421_vm2, %v1588_v16 }
  0x23   : > { %1540 = vmatmul.mubr.msk.bf16.gmra.mrb[8].mxu1 %vm421_vm2, %v1589_v17  ;;  %1511 = vmatprep.mubr.msk.bf16.mxu0 %vm421_vm2, %v1590_v18 }
  0x24   : > { %1543 = vmatprep.mubr.msk.bf16.mxu1 %vm421_vm2, %v1591_v19 }
  0x2a   : > { %1512 = vmatmul.mubr.msk.bf16.gmra.mrb[12].mxu0 %vm421_vm2, %v1592_v20 }
  0x2b   : > { %1544 = vmatmul.mubr.msk.bf16.gmra.mrb[12].mxu1 %vm421_vm2, %v1593_v21  ;;  %1515 = vmatprep.mubr.msk.bf16.mxu0 %vm421_vm2, %v1594_v22 }
  0x2c   : > { %1547 = vmatprep.mubr.msk.bf16.mxu1 %vm421_vm2, %v1595_v23 }
  0x32   : > { %1516 = vmatmul.mubr.msk.bf16.gmra.mrb[16].mxu0 %vm421_vm2, %v1596_v24 }
  0x33   : > { %1548 = vmatmul.mubr.msk.bf16.gmra.mrb[16].mxu1 %vm421_vm2, %v1597_v25  ;;  %1519 = vmatprep.mubr.msk.bf16.mxu0 %vm421_vm2, %v1598_v26 }
  0x34   : > { %1551 = vmatprep.mubr.msk.bf16.mxu1 %vm421_vm2, %v1599_v27 }
  0x3a   : > { %1520 = vmatmul.mubr.msk.bf16.gmra.mrb[20].mxu0 %vm421_vm2, %v1600_v28 }
  0x3b   : > { %1552 = vmatmul.mubr.msk.bf16.gmra.mrb[20].mxu1 %vm421_vm2, %v1601_v29  ;;  %1523 = vmatprep.mubr.msk.bf16.mxu0 %vm421_vm2, %v1602_v30 }
  0x3c   : > { %1555 = vmatprep.mubr.msk.bf16.mxu1 %vm421_vm2, %v1603_v31 }
  0x42   : > { %1524 = vmatmul.mubr.msk.bf16.gmra.mrb[24].mxu0 %vm421_vm2, %v1604_v32 }
  0x43   : > { %1556 = vmatmul.mubr.msk.bf16.gmra.mrb[24].mxu1 %vm421_vm2, %v1605_v33  ;;  %1527 = vmatprep.mubr.msk.bf16.mxu0 %vm421_vm2, %v1606_v34 }
  0x44   : > { %1559 = vmatprep.mubr.msk.bf16.mxu1 %vm421_vm2, %v1607_v35 }
  0x4a   : > { %1528 = vmatmul.mubr.msk.bf16.gmra.mrb[28].mxu0 %vm421_vm2, %v1608_v36 }
  0x4b   : > { %1560 = vmatmul.mubr.msk.bf16.gmra.mrb[28].mxu1 %vm421_vm2, %v1609_v37 }
  0xe5   : > { %v1501_v39 = vpop.f32.mrb[0].mxu0 }
  0xe6   : > { %v568_v40 = vadd.f32 %v1501_v39, %v1730_v38  ;;  %v1533_v41 = vpop.f32.mrb[0].mxu1  ;;  %v559_v42 = vpop.f32.mrb[1].mxu0 }
  0xe7   : > { %v696_v43 = vadd.f32 %v1533_v41, %v1730_v38  ;;  %v560_v44 = vadd.f32 %v1730_v38, %v559_v42  ;;  %v687_v45 = vpop.f32.mrb[1].mxu1  ;;  %v1502_v46 = vpop.f32.mrb[2].mxu0 }
  0xe8   : > { %v816_v47 = vmax.f32 %v568_v40, 0.0  ;;  %v688_v48 = vadd.f32 %v1730_v38, %v687_v45  ;;  %v571_v49 = vadd.f32 %v1502_v46, %v1730_v38  ;;  %v1534_v50 = vpop.f32.mrb[2].mxu1  ;;  %v562_v51 = vpop.f32.mrb[3].mxu0 }
  0xe9   : > { %v848_v52 = vmax.f32 %v696_v43, 0.0  ;;  %v814_v53 = vmax.f32 %v560_v44, 0.0  ;;  %v699_v54 = vadd.f32 %v1534_v50, %v1730_v38  ;;  %v563_v55 = vadd.f32 %v1730_v38, %v562_v51  ;;  %v690_v56 = vpop.f32.mrb[3].mxu1 }
  0xea   : > { %v1399_v57 = vpack.c.bf16 %v816_v47, %v816_v47  ;;  %v846_v58 = vmax.f32 %v688_v48, 0.0  ;;  %v817_v59 = vmax.f32 %v571_v49, 0.0  ;;  %v691_v60 = vadd.f32 %v1730_v38, %v690_v56 }
  0xeb   : > { %v1431_v61 = vpack.c.bf16 %v848_v52, %v848_v52  ;;  %v1397_v62 = vpack.c.bf16 %v814_v53, %v814_v53  ;;  %v849_v63 = vmax.f32 %v699_v54, 0.0  ;;  %v815_v0 = vmax.f32 %v563_v55, 0.0 }
  0xec   : > { %1137 = vst.msk [vmem:[%s1742_s27 + $0x8] sm:$0xf] %vm1134_vm3, %v1399_v57  ;;  %v1429_v1 = vpack.c.bf16 %v846_v58, %v846_v58  ;;  %v1400_v2 = vpack.c.bf16 %v817_v59, %v817_v59  ;;  %v847_v3 = vmax.f32 %v691_v60, 0.0 }
  0xed   : > { %1169 = vst.msk [vmem:[%s1742_s27 + $0x88] sm:$0xf] %vm1134_vm3, %v1431_v61  ;;  %1135 = vst.msk [vmem:[%s1742_s27] sm:$0xf] %vm1134_vm3, %v1397_v62  ;;  %v1432_v4 = vpack.c.bf16 %v849_v63, %v849_v63  ;;  %v1398_v5 = vpack.c.bf16 %v815_v0, %v815_v0  ;;  %v1505_v6 = vpop.f32.mrb[4].mxu0 }
  0xee   : > { %1167 = vst.msk [vmem:[%s1742_s27 + $0x80] sm:$0xf] %vm1134_vm3, %v1429_v1  ;;  %1138 = vst.msk [vmem:[%s1742_s27 + $0xc] sm:$0xf] %vm1134_vm3, %v1400_v2  ;;  %v1430_v7 = vpack.c.bf16 %v847_v3, %v847_v3  ;;  %v584_v8 = vadd.f32 %v1505_v6, %v1730_v38  ;;  %v1537_v9 = vpop.f32.mrb[4].mxu1  ;;  %v575_v10 = vpop.f32.mrb[5].mxu0 }
  0xef   : > { %1170 = vst.msk [vmem:[%s1742_s27 + $0x8c] sm:$0xf] %vm1134_vm3, %v1432_v4  ;;  %1136 = vst.msk [vmem:[%s1742_s27 + $0x4] sm:$0xf] %vm1134_vm3, %v1398_v5  ;;  %v712_v11 = vadd.f32 %v1537_v9, %v1730_v38  ;;  %v576_v12 = vadd.f32 %v1730_v38, %v575_v10  ;;  %v703_v13 = vpop.f32.mrb[5].mxu1  ;;  %v1506_v14 = vpop.f32.mrb[6].mxu0 }
  0xf0   : > { %1168 = vst.msk [vmem:[%s1742_s27 + $0x84] sm:$0xf] %vm1134_vm3, %v1430_v7  ;;  %v820_v15 = vmax.f32 %v584_v8, 0.0  ;;  %v704_v16 = vadd.f32 %v1730_v38, %v703_v13  ;;  %v587_v17 = vadd.f32 %v1506_v14, %v1730_v38  ;;  %v1538_v18 = vpop.f32.mrb[6].mxu1  ;;  %v578_v19 = vpop.f32.mrb[7].mxu0 }
  0xf1   : > { %v852_v20 = vmax.f32 %v712_v11, 0.0  ;;  %v818_v21 = vmax.f32 %v576_v12, 0.0  ;;  %v715_v22 = vadd.f32 %v1538_v18, %v1730_v38  ;;  %v579_v23 = vadd.f32 %v1730_v38, %v578_v19  ;;  %v706_v24 = vpop.f32.mrb[7].mxu1 }
  0xf2   : > { %v1403_v25 = vpack.c.bf16 %v820_v15, %v820_v15  ;;  %v850_v26 = vmax.f32 %v704_v16, 0.0  ;;  %v821_v27 = vmax.f32 %v587_v17, 0.0  ;;  %v707_v28 = vadd.f32 %v1730_v38, %v706_v24 }
  0xf3   : > { %v1435_v29 = vpack.c.bf16 %v852_v20, %v852_v20  ;;  %v1401_v30 = vpack.c.bf16 %v818_v21, %v818_v21  ;;  %v853_v31 = vmax.f32 %v715_v22, 0.0  ;;  %v819_v32 = vmax.f32 %v579_v23, 0.0 }
  0xf4   : > { %1141 = vst.msk [vmem:[%s1742_s27 + $0x18] sm:$0xf] %vm1134_vm3, %v1403_v25  ;;  %v1433_v33 = vpack.c.bf16 %v850_v26, %v850_v26  ;;  %v1404_v34 = vpack.c.bf16 %v821_v27, %v821_v27  ;;  %v851_v35 = vmax.f32 %v707_v28, 0.0 }
  0xf5   : > { %1173 = vst.msk [vmem:[%s1742_s27 + $0x98] sm:$0xf] %vm1134_vm3, %v1435_v29  ;;  %1139 = vst.msk [vmem:[%s1742_s27 + $0x10] sm:$0xf] %vm1134_vm3, %v1401_v30  ;;  %v1436_v36 = vpack.c.bf16 %v853_v31, %v853_v31  ;;  %v1402_v37 = vpack.c.bf16 %v819_v32, %v819_v32  ;;  %v1509_v39 = vpop.f32.mrb[8].mxu0 }
  0xf6   : > { %1171 = vst.msk [vmem:[%s1742_s27 + $0x90] sm:$0xf] %vm1134_vm3, %v1433_v33  ;;  %1142 = vst.msk [vmem:[%s1742_s27 + $0x1c] sm:$0xf] %vm1134_vm3, %v1404_v34  ;;  %v1434_v40 = vpack.c.bf16 %v851_v35, %v851_v35  ;;  %v600_v41 = vadd.f32 %v1509_v39, %v1730_v38  ;;  %v1541_v42 = vpop.f32.mrb[8].mxu1  ;;  %v591_v43 = vpop.f32.mrb[9].mxu0 }
  0xf7   : > { %1174 = vst.msk [vmem:[%s1742_s27 + $0x9c] sm:$0xf] %vm1134_vm3, %v1436_v36  ;;  %1140 = vst.msk [vmem:[%s1742_s27 + $0x14] sm:$0xf] %vm1134_vm3, %v1402_v37  ;;  %v728_v44 = vadd.f32 %v1541_v42, %v1730_v38  ;;  %v592_v45 = vadd.f32 %v1730_v38, %v591_v43  ;;  %v719_v46 = vpop.f32.mrb[9].mxu1  ;;  %v1510_v47 = vpop.f32.mrb[10].mxu0 }
  0xf8   : > { %1172 = vst.msk [vmem:[%s1742_s27 + $0x94] sm:$0xf] %vm1134_vm3, %v1434_v40  ;;  %v824_v48 = vmax.f32 %v600_v41, 0.0  ;;  %v720_v49 = vadd.f32 %v1730_v38, %v719_v46  ;;  %v603_v50 = vadd.f32 %v1510_v47, %v1730_v38  ;;  %v1542_v51 = vpop.f32.mrb[10].mxu1  ;;  %v594_v52 = vpop.f32.mrb[11].mxu0 }
  0xf9   : > { %v856_v53 = vmax.f32 %v728_v44, 0.0  ;;  %v822_v54 = vmax.f32 %v592_v45, 0.0  ;;  %v731_v55 = vadd.f32 %v1542_v51, %v1730_v38  ;;  %v595_v56 = vadd.f32 %v1730_v38, %v594_v52  ;;  %v722_v57 = vpop.f32.mrb[11].mxu1 }
  0xfa   : > { %v1407_v58 = vpack.c.bf16 %v824_v48, %v824_v48  ;;  %v854_v59 = vmax.f32 %v720_v49, 0.0  ;;  %v825_v60 = vmax.f32 %v603_v50, 0.0  ;;  %v723_v61 = vadd.f32 %v1730_v38, %v722_v57 }
  0xfb   : > { %v1439_v62 = vpack.c.bf16 %v856_v53, %v856_v53  ;;  %v1405_v63 = vpack.c.bf16 %v822_v54, %v822_v54  ;;  %v857_v0 = vmax.f32 %v731_v55, 0.0  ;;  %v823_v1 = vmax.f32 %v595_v56, 0.0 }
  0xfc   : > { %1145 = vst.msk [vmem:[%s1742_s27 + $0x28] sm:$0xf] %vm1134_vm3, %v1407_v58  ;;  %v1437_v2 = vpack.c.bf16 %v854_v59, %v854_v59  ;;  %v1408_v3 = vpack.c.bf16 %v825_v60, %v825_v60  ;;  %v855_v4 = vmax.f32 %v723_v61, 0.0 }
  0xfd   : > { %1177 = vst.msk [vmem:[%s1742_s27 + $0xa8] sm:$0xf] %vm1134_vm3, %v1439_v62  ;;  %1143 = vst.msk [vmem:[%s1742_s27 + $0x20] sm:$0xf] %vm1134_vm3, %v1405_v63  ;;  %v1440_v5 = vpack.c.bf16 %v857_v0, %v857_v0  ;;  %v1406_v6 = vpack.c.bf16 %v823_v1, %v823_v1  ;;  %v1513_v7 = vpop.f32.mrb[12].mxu0 }
  0xfe   : > { %1175 = vst.msk [vmem:[%s1742_s27 + $0xa0] sm:$0xf] %vm1134_vm3, %v1437_v2  ;;  %1146 = vst.msk [vmem:[%s1742_s27 + $0x2c] sm:$0xf] %vm1134_vm3, %v1408_v3  ;;  %v1438_v8 = vpack.c.bf16 %v855_v4, %v855_v4  ;;  %v616_v9 = vadd.f32 %v1513_v7, %v1730_v38  ;;  %v1545_v10 = vpop.f32.mrb[12].mxu1  ;;  %v607_v11 = vpop.f32.mrb[13].mxu0 }
  0xff   : > { %1178 = vst.msk [vmem:[%s1742_s27 + $0xac] sm:$0xf] %vm1134_vm3, %v1440_v5  ;;  %1144 = vst.msk [vmem:[%s1742_s27 + $0x24] sm:$0xf] %vm1134_vm3, %v1406_v6  ;;  %v744_v12 = vadd.f32 %v1545_v10, %v1730_v38  ;;  %v608_v13 = vadd.f32 %v1730_v38, %v607_v11  ;;  %v735_v14 = vpop.f32.mrb[13].mxu1  ;;  %v1514_v15 = vpop.f32.mrb[14].mxu0 }
 0x100   : > { %1176 = vst.msk [vmem:[%s1742_s27 + $0xa4] sm:$0xf] %vm1134_vm3, %v1438_v8  ;;  %v828_v16 = vmax.f32 %v616_v9, 0.0  ;;  %v736_v17 = vadd.f32 %v1730_v38, %v735_v14  ;;  %v619_v18 = vadd.f32 %v1514_v15, %v1730_v38  ;;  %v1546_v19 = vpop.f32.mrb[14].mxu1  ;;  %v610_v20 = vpop.f32.mrb[15].mxu0 }
 0x101   : > { %v860_v21 = vmax.f32 %v744_v12, 0.0  ;;  %v826_v22 = vmax.f32 %v608_v13, 0.0  ;;  %v747_v23 = vadd.f32 %v1546_v19, %v1730_v38  ;;  %v611_v24 = vadd.f32 %v1730_v38, %v610_v20  ;;  %v738_v25 = vpop.f32.mrb[15].mxu1 }
 0x102   : > { %v1411_v26 = vpack.c.bf16 %v828_v16, %v828_v16  ;;  %v858_v27 = vmax.f32 %v736_v17, 0.0  ;;  %v829_v28 = vmax.f32 %v619_v18, 0.0  ;;  %v739_v29 = vadd.f32 %v1730_v38, %v738_v25 }
 0x103   : > { %v1443_v30 = vpack.c.bf16 %v860_v21, %v860_v21  ;;  %v1409_v31 = vpack.c.bf16 %v826_v22, %v826_v22  ;;  %v861_v32 = vmax.f32 %v747_v23, 0.0  ;;  %v827_v33 = vmax.f32 %v611_v24, 0.0 }
 0x104   : > { %1149 = vst.msk [vmem:[%s1742_s27 + $0x38] sm:$0xf] %vm1134_vm3, %v1411_v26  ;;  %v1441_v34 = vpack.c.bf16 %v858_v27, %v858_v27  ;;  %v1412_v35 = vpack.c.bf16 %v829_v28, %v829_v28  ;;  %v859_v36 = vmax.f32 %v739_v29, 0.0 }
 0x105   : > { %1181 = vst.msk [vmem:[%s1742_s27 + $0xb8] sm:$0xf] %vm1134_vm3, %v1443_v30  ;;  %1147 = vst.msk [vmem:[%s1742_s27 + $0x30] sm:$0xf] %vm1134_vm3, %v1409_v31  ;;  %v1444_v37 = vpack.c.bf16 %v861_v32, %v861_v32  ;;  %v1410_v39 = vpack.c.bf16 %v827_v33, %v827_v33  ;;  %v1517_v40 = vpop.f32.mrb[16].mxu0 }
 0x106   : > { %1179 = vst.msk [vmem:[%s1742_s27 + $0xb0] sm:$0xf] %vm1134_vm3, %v1441_v34  ;;  %1150 = vst.msk [vmem:[%s1742_s27 + $0x3c] sm:$0xf] %vm1134_vm3, %v1412_v35  ;;  %v1442_v41 = vpack.c.bf16 %v859_v36, %v859_v36  ;;  %v632_v42 = vadd.f32 %v1517_v40, %v1730_v38  ;;  %v1549_v43 = vpop.f32.mrb[16].mxu1  ;;  %v623_v44 = vpop.f32.mrb[17].mxu0 }
 0x107   : > { %1182 = vst.msk [vmem:[%s1742_s27 + $0xbc] sm:$0xf] %vm1134_vm3, %v1444_v37  ;;  %1148 = vst.msk [vmem:[%s1742_s27 + $0x34] sm:$0xf] %vm1134_vm3, %v1410_v39  ;;  %v760_v45 = vadd.f32 %v1549_v43, %v1730_v38  ;;  %v624_v46 = vadd.f32 %v1730_v38, %v623_v44  ;;  %v751_v47 = vpop.f32.mrb[17].mxu1  ;;  %v1518_v48 = vpop.f32.mrb[18].mxu0 }
 0x108   : > { %1180 = vst.msk [vmem:[%s1742_s27 + $0xb4] sm:$0xf] %vm1134_vm3, %v1442_v41  ;;  %v832_v49 = vmax.f32 %v632_v42, 0.0  ;;  %v752_v50 = vadd.f32 %v1730_v38, %v751_v47  ;;  %v635_v51 = vadd.f32 %v1518_v48, %v1730_v38  ;;  %v1550_v52 = vpop.f32.mrb[18].mxu1  ;;  %v626_v53 = vpop.f32.mrb[19].mxu0 }
 0x109   : > { %v864_v54 = vmax.f32 %v760_v45, 0.0  ;;  %v830_v55 = vmax.f32 %v624_v46, 0.0  ;;  %v763_v56 = vadd.f32 %v1550_v52, %v1730_v38  ;;  %v627_v57 = vadd.f32 %v1730_v38, %v626_v53  ;;  %v754_v58 = vpop.f32.mrb[19].mxu1 }
 0x10a   : > { %v1415_v59 = vpack.c.bf16 %v832_v49, %v832_v49  ;;  %v862_v60 = vmax.f32 %v752_v50, 0.0  ;;  %v833_v61 = vmax.f32 %v635_v51, 0.0  ;;  %v755_v62 = vadd.f32 %v1730_v38, %v754_v58 }
 0x10b   : > { %v1447_v63 = vpack.c.bf16 %v864_v54, %v864_v54  ;;  %v1413_v0 = vpack.c.bf16 %v830_v55, %v830_v55  ;;  %v865_v1 = vmax.f32 %v763_v56, 0.0  ;;  %v831_v2 = vmax.f32 %v627_v57, 0.0 }
 0x10c   : > { %1153 = vst.msk [vmem:[%s1742_s27 + $0x48] sm:$0xf] %vm1134_vm3, %v1415_v59  ;;  %v1445_v3 = vpack.c.bf16 %v862_v60, %v862_v60  ;;  %v1416_v4 = vpack.c.bf16 %v833_v61, %v833_v61  ;;  %v863_v5 = vmax.f32 %v755_v62, 0.0 }
 0x10d   : > { %1185 = vst.msk [vmem:[%s1742_s27 + $0xc8] sm:$0xf] %vm1134_vm3, %v1447_v63  ;;  %1151 = vst.msk [vmem:[%s1742_s27 + $0x40] sm:$0xf] %vm1134_vm3, %v1413_v0  ;;  %v1448_v6 = vpack.c.bf16 %v865_v1, %v865_v1  ;;  %v1414_v7 = vpack.c.bf16 %v831_v2, %v831_v2  ;;  %v1521_v8 = vpop.f32.mrb[20].mxu0 }
 0x10e   : > { %1183 = vst.msk [vmem:[%s1742_s27 + $0xc0] sm:$0xf] %vm1134_vm3, %v1445_v3  ;;  %1154 = vst.msk [vmem:[%s1742_s27 + $0x4c] sm:$0xf] %vm1134_vm3, %v1416_v4  ;;  %v1446_v9 = vpack.c.bf16 %v863_v5, %v863_v5  ;;  %v648_v10 = vadd.f32 %v1521_v8, %v1730_v38  ;;  %v1553_v11 = vpop.f32.mrb[20].mxu1  ;;  %v639_v12 = vpop.f32.mrb[21].mxu0 }
 0x10f   : > { %1186 = vst.msk [vmem:[%s1742_s27 + $0xcc] sm:$0xf] %vm1134_vm3, %v1448_v6  ;;  %1152 = vst.msk [vmem:[%s1742_s27 + $0x44] sm:$0xf] %vm1134_vm3, %v1414_v7  ;;  %v776_v13 = vadd.f32 %v1553_v11, %v1730_v38  ;;  %v640_v14 = vadd.f32 %v1730_v38, %v639_v12  ;;  %v767_v15 = vpop.f32.mrb[21].mxu1  ;;  %v1522_v16 = vpop.f32.mrb[22].mxu0 }
 0x110   : > { %1184 = vst.msk [vmem:[%s1742_s27 + $0xc4] sm:$0xf] %vm1134_vm3, %v1446_v9  ;;  %v836_v17 = vmax.f32 %v648_v10, 0.0  ;;  %v768_v18 = vadd.f32 %v1730_v38, %v767_v15  ;;  %v651_v19 = vadd.f32 %v1522_v16, %v1730_v38  ;;  %v1554_v20 = vpop.f32.mrb[22].mxu1  ;;  %v642_v21 = vpop.f32.mrb[23].mxu0 }
 0x111   : > { %v868_v22 = vmax.f32 %v776_v13, 0.0  ;;  %v834_v23 = vmax.f32 %v640_v14, 0.0  ;;  %v779_v24 = vadd.f32 %v1554_v20, %v1730_v38  ;;  %v643_v25 = vadd.f32 %v1730_v38, %v642_v21  ;;  %v770_v26 = vpop.f32.mrb[23].mxu1 }
 0x112   : > { %v1419_v27 = vpack.c.bf16 %v836_v17, %v836_v17  ;;  %v866_v28 = vmax.f32 %v768_v18, 0.0  ;;  %v837_v29 = vmax.f32 %v651_v19, 0.0  ;;  %v771_v30 = vadd.f32 %v1730_v38, %v770_v26 }
 0x113   : > { %v1451_v31 = vpack.c.bf16 %v868_v22, %v868_v22  ;;  %v1417_v32 = vpack.c.bf16 %v834_v23, %v834_v23  ;;  %v869_v33 = vmax.f32 %v779_v24, 0.0  ;;  %v835_v34 = vmax.f32 %v643_v25, 0.0 }
 0x114   : > { %1157 = vst.msk [vmem:[%s1742_s27 + $0x58] sm:$0xf] %vm1134_vm3, %v1419_v27  ;;  %v1449_v35 = vpack.c.bf16 %v866_v28, %v866_v28  ;;  %v1420_v36 = vpack.c.bf16 %v837_v29, %v837_v29  ;;  %v867_v37 = vmax.f32 %v771_v30, 0.0 }
 0x115   : > { %1189 = vst.msk [vmem:[%s1742_s27 + $0xd8] sm:$0xf] %vm1134_vm3, %v1451_v31  ;;  %1155 = vst.msk [vmem:[%s1742_s27 + $0x50] sm:$0xf] %vm1134_vm3, %v1417_v32  ;;  %v1452_v39 = vpack.c.bf16 %v869_v33, %v869_v33  ;;  %v1418_v40 = vpack.c.bf16 %v835_v34, %v835_v34  ;;  %v1525_v41 = vpop.f32.mrb[24].mxu0 }
 0x116   : > { %1187 = vst.msk [vmem:[%s1742_s27 + $0xd0] sm:$0xf] %vm1134_vm3, %v1449_v35  ;;  %1158 = vst.msk [vmem:[%s1742_s27 + $0x5c] sm:$0xf] %vm1134_vm3, %v1420_v36  ;;  %v1450_v42 = vpack.c.bf16 %v867_v37, %v867_v37  ;;  %v664_v43 = vadd.f32 %v1525_v41, %v1730_v38  ;;  %v1557_v44 = vpop.f32.mrb[24].mxu1  ;;  %v655_v45 = vpop.f32.mrb[25].mxu0 }
 0x117   : > { %1190 = vst.msk [vmem:[%s1742_s27 + $0xdc] sm:$0xf] %vm1134_vm3, %v1452_v39  ;;  %1156 = vst.msk [vmem:[%s1742_s27 + $0x54] sm:$0xf] %vm1134_vm3, %v1418_v40  ;;  %v792_v46 = vadd.f32 %v1557_v44, %v1730_v38  ;;  %v656_v47 = vadd.f32 %v1730_v38, %v655_v45  ;;  %v783_v48 = vpop.f32.mrb[25].mxu1  ;;  %v1526_v49 = vpop.f32.mrb[26].mxu0 }
 0x118   : > { %1188 = vst.msk [vmem:[%s1742_s27 + $0xd4] sm:$0xf] %vm1134_vm3, %v1450_v42  ;;  %v840_v50 = vmax.f32 %v664_v43, 0.0  ;;  %v784_v51 = vadd.f32 %v1730_v38, %v783_v48  ;;  %v667_v52 = vadd.f32 %v1526_v49, %v1730_v38  ;;  %v1558_v53 = vpop.f32.mrb[26].mxu1  ;;  %v658_v54 = vpop.f32.mrb[27].mxu0 }
 0x119   : > { %v872_v55 = vmax.f32 %v792_v46, 0.0  ;;  %v838_v56 = vmax.f32 %v656_v47, 0.0  ;;  %v795_v57 = vadd.f32 %v1558_v53, %v1730_v38  ;;  %v659_v58 = vadd.f32 %v1730_v38, %v658_v54  ;;  %v786_v59 = vpop.f32.mrb[27].mxu1 }
 0x11a   : > { %v1423_v60 = vpack.c.bf16 %v840_v50, %v840_v50  ;;  %v870_v61 = vmax.f32 %v784_v51, 0.0  ;;  %v841_v62 = vmax.f32 %v667_v52, 0.0  ;;  %v787_v63 = vadd.f32 %v1730_v38, %v786_v59 }
 0x11b   : > { %v1455_v0 = vpack.c.bf16 %v872_v55, %v872_v55  ;;  %v1421_v1 = vpack.c.bf16 %v838_v56, %v838_v56  ;;  %v873_v2 = vmax.f32 %v795_v57, 0.0  ;;  %v839_v3 = vmax.f32 %v659_v58, 0.0 }
 0x11c   : > { %1161 = vst.msk [vmem:[%s1742_s27 + $0x68] sm:$0xf] %vm1134_vm3, %v1423_v60  ;;  %v1453_v4 = vpack.c.bf16 %v870_v61, %v870_v61  ;;  %v1424_v5 = vpack.c.bf16 %v841_v62, %v841_v62  ;;  %v871_v6 = vmax.f32 %v787_v63, 0.0 }
 0x11d   : > { %1193 = vst.msk [vmem:[%s1742_s27 + $0xe8] sm:$0xf] %vm1134_vm3, %v1455_v0  ;;  %1159 = vst.msk [vmem:[%s1742_s27 + $0x60] sm:$0xf] %vm1134_vm3, %v1421_v1  ;;  %v1456_v7 = vpack.c.bf16 %v873_v2, %v873_v2  ;;  %v1422_v8 = vpack.c.bf16 %v839_v3, %v839_v3  ;;  %v1529_v9 = vpop.f32.mrb[28].mxu0 }
 0x11e   : > { %1191 = vst.msk [vmem:[%s1742_s27 + $0xe0] sm:$0xf] %vm1134_vm3, %v1453_v4  ;;  %1162 = vst.msk [vmem:[%s1742_s27 + $0x6c] sm:$0xf] %vm1134_vm3, %v1424_v5  ;;  %v1454_v10 = vpack.c.bf16 %v871_v6, %v871_v6  ;;  %v680_v11 = vadd.f32 %v1529_v9, %v1730_v38  ;;  %v1561_v12 = vpop.f32.mrb[28].mxu1  ;;  %v671_v13 = vpop.f32.mrb[29].mxu0 }
 0x11f   : > { %1194 = vst.msk [vmem:[%s1742_s27 + $0xec] sm:$0xf] %vm1134_vm3, %v1456_v7  ;;  %1160 = vst.msk [vmem:[%s1742_s27 + $0x64] sm:$0xf] %vm1134_vm3, %v1422_v8  ;;  %v808_v14 = vadd.f32 %v1561_v12, %v1730_v38  ;;  %v672_v15 = vadd.f32 %v1730_v38, %v671_v13  ;;  %v799_v16 = vpop.f32.mrb[29].mxu1  ;;  %v1530_v17 = vpop.f32.mrb[30].mxu0 }
 0x120   : > { %1192 = vst.msk [vmem:[%s1742_s27 + $0xe4] sm:$0xf] %vm1134_vm3, %v1454_v10  ;;  %v844_v18 = vmax.f32 %v680_v11, 0.0  ;;  %v800_v19 = vadd.f32 %v1730_v38, %v799_v16  ;;  %v683_v20 = vadd.f32 %v1530_v17, %v1730_v38  ;;  %v1562_v21 = vpop.f32.mrb[30].mxu1  ;;  %v674_v22 = vpop.f32.mrb[31].mxu0 }
 0x121   : > { %v876_v23 = vmax.f32 %v808_v14, 0.0  ;;  %v842_v24 = vmax.f32 %v672_v15, 0.0  ;;  %v811_v25 = vadd.f32 %v1562_v21, %v1730_v38  ;;  %v675_v26 = vadd.f32 %v1730_v38, %v674_v22  ;;  %v802_v27 = vpop.f32.mrb[31].mxu1 }
 0x122   : > { %v1427_v28 = vpack.c.bf16 %v844_v18, %v844_v18  ;;  %v874_v29 = vmax.f32 %v800_v19, 0.0  ;;  %v845_v30 = vmax.f32 %v683_v20, 0.0  ;;  %v803_v31 = vadd.f32 %v1730_v38, %v802_v27 }
 0x123   : > { %v1459_v32 = vpack.c.bf16 %v876_v23, %v876_v23  ;;  %v1425_v33 = vpack.c.bf16 %v842_v24, %v842_v24  ;;  %v877_v34 = vmax.f32 %v811_v25, 0.0  ;;  %v843_v35 = vmax.f32 %v675_v26, 0.0 }
 0x124   : > { %1165 = vst.msk [vmem:[%s1742_s27 + $0x78] sm:$0xf] %vm1134_vm3, %v1427_v28  ;;  %v1457_v36 = vpack.c.bf16 %v874_v29, %v874_v29  ;;  %v1428_v37 = vpack.c.bf16 %v845_v30, %v845_v30  ;;  %v875_v39 = vmax.f32 %v803_v31, 0.0 }
 0x125   : > { %1197 = vst.msk [vmem:[%s1742_s27 + $0xf8] sm:$0xf] %vm1134_vm3, %v1459_v32  ;;  %1163 = vst.msk [vmem:[%s1742_s27 + $0x70] sm:$0xf] %vm1134_vm3, %v1425_v33  ;;  %v1460_v40 = vpack.c.bf16 %v877_v34, %v877_v34  ;;  %v1426_v41 = vpack.c.bf16 %v843_v35, %v843_v35 }
 0x126   : > { %1195 = vst.msk [vmem:[%s1742_s27 + $0xf0] sm:$0xf] %vm1134_vm3, %v1457_v36  ;;  %1166 = vst.msk [vmem:[%s1742_s27 + $0x7c] sm:$0xf] %vm1134_vm3, %v1428_v37  ;;  %v1458_v38 = vpack.c.bf16 %v875_v39, %v875_v39 }
 0x127   : > { %1198 = vst.msk [vmem:[%s1742_s27 + $0xfc] sm:$0xf] %vm1134_vm3, %v1460_v40  ;;  %1164 = vst.msk [vmem:[%s1742_s27 + $0x74] sm:$0xf] %vm1134_vm3, %v1426_v41 }
 0x128   : > { %1196 = vst.msk [vmem:[%s1742_s27 + $0xf4] sm:$0xf] %vm1134_vm3, %v1458_v38 }
 0x129 PF: > { %s13_s12 = sadd.s32 1, %s1616_s12  }
 0x12a   : > { %p10_p4 = scmp.ge.s32.totalorder %s13_s12, 27  }
 0x12c   :  { %12 = sbr.rel (!%p10_p4) target bundleno = 1 (0x1), region = 62 }

</bundles_post_ra>
